<compile_context>
chip_gen: v7x
topology: tpu7x:2x2x1
jax: 0.10.0
libtpu: 0.0.40
codegen_flags: <defaults>
</compile_context>

<pallas_src>
import jax
import jax.numpy as jnp
from jax import lax
from jax.experimental import pallas as pl
from jax.experimental.pallas import tpu as pltpu


def _round_up(x, m):
    return ((x + m - 1) // m) * m


# ----------------------------------------------------------------------------
# Tile / budget selection
# ----------------------------------------------------------------------------

def _vmem_budget_bytes():
    """(double-buffered footprint budget, vmem_limit cap) per TPU generation."""
    vmem_cap = 64 * 1024 * 1024
    try:
        vmem_cap = int(pltpu.get_tpu_info().vmem_capacity_bytes)
    except Exception:
        pass
    if vmem_cap >= 100 * 1024 * 1024:            # v5e / v6e: 128 MiB physical
        return 48 * 1024 * 1024, 96 * 1024 * 1024
    return 24 * 1024 * 1024, 40 * 1024 * 1024    # v7x: 64 MiB physical VMEM/TC


def _pick_tn(tw):
    """Pick TN from {128,256,384,512} minimizing the padded Np overshoot."""
    best_tn, best_np = 128, _round_up(tw, 128)
    for tn in (256, 384, 512):
        np_ = _round_up(tw, tn)
        if np_ < best_np or (np_ == best_np and tn > best_tn):
            best_tn, best_np = tn, np_
    return best_tn, best_np


def _pick_tk(nf, tn, forced_tk=None, weight_tile_budget=6 * 1024 * 1024):
    """Tile K only when the double-buffered bf16 weight tile would be large."""
    if forced_tk is not None:
        tk = int(forced_tk)
        assert tk >= nf or tk % 128 == 0, "forced K tile must be a multiple of 128"
        tk = min(tk, _round_up(nf, 128))
    elif 2 * tn * nf * 2 <= weight_tile_budget:  # dbl-buffered bf16 weight tile
        return nf, nf                            # K untiled
    else:
        tk = min(1024, _round_up(nf, 128))
    kp = _round_up(nf, tk)
    return tk, kp


def _pick_tm(M, tk, tn, out_itemsize, budget):
    """Pick TM so the double-buffered per-step footprint fits the budget."""
    fixed = 2 * tk * tn * 2 + 2 * tn * 4                    # weight (bf16) + bias
    per_row = 2 * tk * 4 + 2 * tn * out_itemsize + tn * 4   # x (f32) + out + acc
    avail = max(budget - fixed, per_row * 8)
    tm = avail // per_row
    m8 = _round_up(M, 8)
    if tm >= m8:
        tm = m8                                  # single M tile, no padding waste
    elif tm >= 256:
        tm = min(512, (tm // 256) * 256)         # MXU-friendly (2x256^2 on v6e/v7x)
    else:
        tm = max(8, (tm // 8) * 8)
    footprint = fixed + per_row * tm
    return int(tm), int(footprint)


# ----------------------------------------------------------------------------
# Kernel
# ----------------------------------------------------------------------------

def _linear_kernel(x_ref, w_ref, b_ref, o_ref, acc_ref):
    # x_ref: [TM, TK] f32 (cast to bf16 in VMEM, so x crosses HBM once as f32)
    # w_ref: [TK, TN] bf16 (pre-transposed / pre-padded, cached across calls)
    # b_ref: [1,  TN] f32
    # o_ref: [TM, TN] out dtype; acc_ref: [TM, TN] f32 scratch
    k = pl.program_id(2)

    @pl.when(k == 0)
    def _():
        acc_ref[...] = jnp.zeros_like(acc_ref)

    acc_ref[...] += jnp.dot(
        x_ref[...].astype(jnp.bfloat16),
        w_ref[...],
        preferred_element_type=jnp.float32,
    )

    @pl.when(k == pl.num_programs(2) - 1)
    def _():
        o_ref[...] = (acc_ref[...] + b_ref[...]).astype(o_ref.dtype)


# ----------------------------------------------------------------------------
# Wrapper
# ----------------------------------------------------------------------------

def prepare_flatten_head_params(weight, bias, *, force_k_tile=None):
    """One-time (cached) parameter prep: transpose to [nf, tw], bf16 cast, pad.

    In steady-state inference this runs once at module init, so the weight's
    dtype conversion / padding / transpose never touches HBM on the hot path.
    """
    tw, nf = weight.shape
    tn, np_ = _pick_tn(tw)
    tk, kp = _pick_tk(nf, tn, forced_tk=force_k_tile)

    w = jnp.asarray(weight).T.astype(jnp.bfloat16)          # [nf, tw], K-major
    if kp != nf or np_ != tw:
        w = jnp.pad(w, ((0, kp - nf), (0, np_ - tw)))
    b = jnp.asarray(bias).astype(jnp.float32).reshape(1, tw)
    if np_ != tw:
        b = jnp.pad(b, ((0, 0), (0, np_ - tw)))

    meta = dict(nf=nf, tw=tw, tn=tn, np=np_, tk=tk, kp=kp)
    return w, b, meta


def flatten_head_forward(x, w_prepped, b_prepped, meta):
    """x: [bs, n_vars, d_model, patch_num] -> [bs, n_vars, target_window]."""
    bs, n_vars, d_model, patch_num = x.shape
    nf = d_model * patch_num
    assert nf == meta["nf"], "prepared params built for a different nf"
    tw, tn, np_, tk, kp = meta["tw"], meta["tn"], meta["np"], meta["tk"], meta["kp"]

    out_dtype = x.dtype
    out_itemsize = jnp.dtype(out_dtype).itemsize
    M = bs * n_vars

    budget, limit_cap = _vmem_budget_bytes()
    tm, footprint = _pick_tm(M, tk, tn, out_itemsize, budget)
    mp = _round_up(M, tm)

    # flatten(start_dim=-2): merge the last two dims (row-major, same as torch).
    # x stays f32 here; the bf16 cast is done in-kernel so x is read once.
    x2 = x.reshape(M, nf)
    if mp != M or kp != nf:
        x2 = jnp.pad(x2, ((0, mp - M), (0, kp - nf)))

    # Grid: N outermost, M inner, K innermost (reduction). With K untiled the
    # weight block index (k=0, j) is constant across the inner M loop, so the
    # weight is streamed from HBM exactly once per N tile.
    grid = (np_ // tn, mp // tm, kp // tk)

    cost = pl.CostEstimate(
        flops=2 * mp * kp * np_,
        transcendentals=0,
        bytes_accessed=(mp * kp * 4 + kp * np_ * 2 + np_ * 4
                        + mp * np_ * out_itemsize),
    )
    vmem_limit = int(min(limit_cap,
                         max(footprint + 4 * 1024 * 1024, 16 * 1024 * 1024)))

    out = pl.pallas_call(
        _linear_kernel,
        out_shape=jax.ShapeDtypeStruct((mp, np_), out_dtype),
        grid=grid,
        in_specs=[
            pl.BlockSpec((tm, tk), lambda j, i, k: (i, k)),   # activations (f32)
            pl.BlockSpec((tk, tn), lambda j, i, k: (k, j)),   # weight (bf16, [K,N])
            pl.BlockSpec((1, tn), lambda j, i, k: (0, j)),    # bias: DMA'd once per N tile
        ],
        out_specs=pl.BlockSpec((tm, tn), lambda j, i, k: (i, j)),
        scratch_shapes=[pltpu.VMEM((tm, tn), jnp.float32)],
        compiler_params=pltpu.CompilerParams(
            # Shard the N axis across TensorCores (v7x): each core reads half
            # the (dominant) weight and re-reads the small x matrix instead.
            dimension_semantics=("parallel", "arbitrary", "arbitrary"),
            vmem_limit_bytes=vmem_limit,
        ),
        cost_estimate=cost,
    )(x2, w_prepped, b_prepped)

    # Strip padding; dropout with head_dropout=0 (eval mode) is the identity.
    return out[:M, :tw].reshape(bs, n_vars, tw)


# ----------------------------------------------------------------------------
# Self-test
# ----------------------------------------------------------------------------

if __name__ == "__main__":
    bs, n_vars, d_model, patch_num = 2, 4, 16, 16
    nf = d_model * patch_num            # 256
    target_window = 24

    key = jax.random.PRNGKey(0)
    kx, kw, kb = jax.random.split(key, 3)

    x = jax.random.normal(kx, (bs, n_vars, d_model, patch_num), dtype=jnp.float32)

    # Deterministic init mirroring nn.Linear's uniform(-1/sqrt(nf), 1/sqrt(nf)).
    bound = 1.0 / jnp.sqrt(jnp.float32(nf))
    weight = jax.random.uniform(kw, (target_window, nf), jnp.float32, -bound, bound)
    bias = jax.random.uniform(kb, (target_window,), jnp.float32, -bound, bound)

    # References.
    x_flat = x.reshape(bs, n_vars, nf)
    x_q = x_flat.astype(jnp.bfloat16).astype(jnp.float32)
    w_q = weight.astype(jnp.bfloat16).astype(jnp.float32)
    ref_q = jnp.einsum("bvk,tk->bvt", x_q, w_q,
                       precision=lax.Precision.HIGHEST) + bias
    ref_full = jnp.einsum("bvk,tk->bvt", x_flat, weight,
                          precision=lax.Precision.HIGHEST) + bias

    # 1) Default path: K untiled, weight resident across the inner M loop.
    w_p, b_p, meta = prepare_flatten_head_params(weight, bias)
    y = jax.block_until_ready(flatten_head_forward(x, w_p, b_p, meta))
    assert y.shape == (bs, n_vars, target_window)
    assert jnp.allclose(y, ref_q, atol=1e-4, rtol=1e-4)
    # bf16 operand rounding only (intentional precision tradeoff vs f32 Linear).
    assert jnp.allclose(y, ref_full, atol=3e-2, rtol=3e-2)

    # 2) Forced K tiling: exercises the f32 accumulator / pl.when init-finalize path.
    w_p2, b_p2, meta2 = prepare_flatten_head_params(weight, bias, force_k_tile=128)
    y2 = jax.block_until_ready(flatten_head_forward(x, w_p2, b_p2, meta2))
    assert jnp.allclose(y2, ref_q, atol=1e-4, rtol=1e-4)

    print("KERNEL_OK")
</pallas_src>

<mosaic_0001>
module attributes {stable_mosaic.version = 11 : i64} {
  func.func @_linear_kernel(%arg0: i32, %arg1: i32, %arg2: i32, %arg3: memref<8x256xf32, #tpu.memory_space<vmem>>, %arg4: memref<256x128xbf16, #tpu.memory_space<vmem>>, %arg5: memref<1x128xf32, #tpu.memory_space<vmem>>, %arg6: memref<8x128xf32, #tpu.memory_space<vmem>>, %arg7: memref<8x128xf32, #tpu.memory_space<vmem>>) attributes {dimension_semantics = [#tpu.dimension_semantics<parallel>, #tpu.dimension_semantics<arbitrary>, #tpu.dimension_semantics<arbitrary>], iteration_bounds = array<i64: 1, 1, 1>, scalar_prefetch = 0 : i64, scratch_operands = 1 : i64, tpu.core_type = #tpu.core_type<tc>, window_params = [{transform_indices = @transform_0, window_bounds = array<i64: 8, 256>}, {transform_indices = @transform_1, window_bounds = array<i64: 256, 128>}, {transform_indices = @transform_2, window_bounds = array<i64: 1, 128>}, {transform_indices = @transform_3, window_bounds = array<i64: 8, 128>}]} {
    %c0_i32 = arith.constant 0 : i32
    %0 = arith.cmpi eq, %arg2, %c0_i32 : i32
    %1 = arith.extui %0 : i1 to i32
    %c0_i32_0 = arith.constant 0 : i32
    %2 = arith.cmpi ne, %1, %c0_i32_0 : i32
    scf.if %2 {
      %cst_10 = arith.constant 0.000000e+00 : f32
      %13 = vector.broadcast %cst_10 : f32 to vector<8x128xf32>
      %c0_11 = arith.constant 0 : index
      %c0_12 = arith.constant 0 : index
      %14 = vector.load %arg7[%c0_11, %c0_12] : memref<8x128xf32, #tpu.memory_space<vmem>>, vector<8x128xf32>
      tpu.vector_store %arg7[%c0_11, %c0_12], %13 {strides = array<i32>} : memref<8x128xf32, #tpu.memory_space<vmem>>, vector<8x128xf32>,
    } else {
    }
    %c0 = arith.constant 0 : index
    %c0_1 = arith.constant 0 : index
    %3 = vector.load %arg7[%c0, %c0_1] : memref<8x128xf32, #tpu.memory_space<vmem>>, vector<8x128xf32>
    %c0_2 = arith.constant 0 : index
    %c0_3 = arith.constant 0 : index
    %4 = vector.load %arg3[%c0_2, %c0_3] : memref<8x256xf32, #tpu.memory_space<vmem>>, vector<8x256xf32>
    %5 = arith.truncf %4 : vector<8x256xf32> to vector<8x256xbf16>
    %c0_4 = arith.constant 0 : index
    %c0_5 = arith.constant 0 : index
    %6 = vector.load %arg4[%c0_4, %c0_5] : memref<256x128xbf16, #tpu.memory_space<vmem>>, vector<256x128xbf16>
    %cst = arith.constant dense<0.000000e+00> : vector<8x128xf32>
    %7 = tpu.matmul %5, %6, %cst {dimension_numbers = #tpu.dot_dimension_numbers<[1], [0], [0], [1], [0, 0, 1, 1], [], []>} : vector<8x256xbf16>, vector<256x128xbf16>, vector<8x128xf32> -> vector<8x128xf32>
    %8 = arith.addf %3, %7 : vector<8x128xf32>
    %c0_6 = arith.constant 0 : index
    %c0_7 = arith.constant 0 : index
    %9 = vector.load %arg7[%c0_6, %c0_7] : memref<8x128xf32, #tpu.memory_space<vmem>>, vector<8x128xf32>
    tpu.vector_store %arg7[%c0_6, %c0_7], %8 {strides = array<i32>} : memref<8x128xf32, #tpu.memory_space<vmem>>, vector<8x128xf32>,
    %c0_i32_8 = arith.constant 0 : i32
    %10 = arith.cmpi eq, %arg2, %c0_i32_8 : i32
    %11 = arith.extui %10 : i1 to i32
    %c0_i32_9 = arith.constant 0 : i32
    %12 = arith.cmpi ne, %11, %c0_i32_9 : i32
    scf.if %12 {
      %c0_10 = arith.constant 0 : index
      %c0_11 = arith.constant 0 : index
      %13 = vector.load %arg7[%c0_10, %c0_11] : memref<8x128xf32, #tpu.memory_space<vmem>>, vector<8x128xf32>
      %c0_12 = arith.constant 0 : index
      %c0_13 = arith.constant 0 : index
      %14 = vector.load %arg5[%c0_12, %c0_13] : memref<1x128xf32, #tpu.memory_space<vmem>>, vector<1x128xf32>
      %15 = vector.broadcast %14 : vector<1x128xf32> to vector<8x128xf32>
      %16 = arith.addf %13, %15 : vector<8x128xf32>
      %c0_14 = arith.constant 0 : index
      %c0_15 = arith.constant 0 : index
      %17 = vector.load %arg6[%c0_14, %c0_15] : memref<8x128xf32, #tpu.memory_space<vmem>>, vector<8x128xf32>
      tpu.vector_store %arg6[%c0_14, %c0_15], %16 {strides = array<i32>} : memref<8x128xf32, #tpu.memory_space<vmem>>, vector<8x128xf32>,
    } else {
    }
    return
  }
  func.func @transform_0(%arg0: i32, %arg1: i32, %arg2: i32) -> (i32, i32) {
    %c0_i32 = arith.constant 0 : i32
    return %arg1, %arg2 : i32, i32
  }
  func.func @transform_1(%arg0: i32, %arg1: i32, %arg2: i32) -> (i32, i32) {
    %c0_i32 = arith.constant 0 : i32
    return %arg2, %arg0 : i32, i32
  }
  func.func @transform_2(%arg0: i32, %arg1: i32, %arg2: i32) -> (i32, i32) {
    %c0_i32 = arith.constant 0 : i32
    %c0_i32_0 = arith.constant 0 : i32
    return %c0_i32, %arg0 : i32, i32
  }
  func.func @transform_3(%arg0: i32, %arg1: i32, %arg2: i32) -> (i32, i32) {
    %c0_i32 = arith.constant 0 : i32
    return %arg1, %arg0 : i32, i32
  }
}

</mosaic_0001>

<bundles_post_ra>
// kernel: tpu_custom_call.1
= control target key start
LH: loop header
LB: loop body
LE: loop exit
PB: predicated region body
PF: predicated region fallthrough
CT: control target
= control target key end

     0   :  { %8 = vsyncpa [#allocation4], 0  ;;  %s454_s0 = inlined_call_operand.hbm [shape: f32[8,256], index: 0, kind: input, shape index: {}]   ;;  %s455_s1 = inlined_call_operand.hbm [shape: bf16[256,128], index: 1, kind: input, shape index: {}]   ;;  %s456_s2 = inlined_call_operand.vmem [shape: f32[1,128], index: 2, kind: input, shape index: {}]   ;;  %s457_s3 = inlined_call_operand.hbm [shape: f32[8,128], index: 3, kind: output, shape index: {}]  }
   0x1   :  { %9 = vsyncpa [#allocation7], 0 }
   0x2   :  { %10 = vsyncpa [#allocation5], 0  ;;  %s383_s12 = smov [#allocation3]   ;;  %s384_s14 = smov [#allocation6]  }
   0x3   :  { %s17_s13 = sshll.u32 %s383_s12, 4  ;;  %s26_s15 = sshll.u32 %s384_s14, 4  ;;  %s18_s13 = int_to_ptr.vmem [resolvable:$true] %s17_s13  ;;  %s408_s15 = int_to_ptr.vmem [resolvable:$true] %s26_s15 }
   0x4   :  { %s311_s18 = scalar_lea.hbm %s454_s0, 256 }
   0x5   :  { %p312_p0 = scmp.ne.s32.totalorder %s454_s0, %s311_s18  ;;  %p315_p1 = scmp.lt.u32.totalorder %s311_s18, %s454_s0 }
   0x7   :  { %p317_p2 = pnand %p315_p1, %p312_p0 }
   0x9   :  { %320 = shalt.err (!%p317_p2)
}
   0xa   :  { %s321_s23 = scalar_lea.vmem %s18_s13, 256  ;;  %p326_p4 = scmp.lt.s32.totalorder %s18_s13, %s18_s13 }
   0xb   :  { %p322_p3 = scmp.ne.s32.totalorder %s18_s13, %s321_s23  ;;  %p327_p5 = scmp.lt.s32.totalorder %s321_s23, %s321_s23 }
   0xd   :  { %p328_p6 = por %p327_p5, %p326_p4 }
   0xf   :  { %p329_p7 = pnand %p328_p6, %p322_p3 }
  0x11   :  { %332 = shalt.err (!%p329_p7)
}
  0x12   :  { %20 = dma.hbm_to_vmem [thread:$0]  %s454_s0, 256, %s18_s13, [#allocation4]  }
  0x13   :  { %s333_s28 = scalar_lea.hbm %s455_s1, 2048 }
  0x14   :  { %p334_p8 = scmp.ne.s32.totalorder %s455_s1, %s333_s28  ;;  %p337_p9 = scmp.lt.u32.totalorder %s333_s28, %s455_s1 }
  0x16   :  { %p339_p10 = pnand %p337_p9, %p334_p8 }
  0x18   :  { %342 = shalt.err (!%p339_p10)
}
  0x19   :  { %s343_s6 = scalar_lea.vmem %s408_s15, 2048  ;;  %p348_p12 = scmp.lt.s32.totalorder %s408_s15, %s408_s15 }
  0x1a   :  { %p344_p11 = scmp.ne.s32.totalorder %s408_s15, %s343_s6  ;;  %p349_p13 = scmp.lt.s32.totalorder %s343_s6, %s343_s6 }
  0x1c   :  { %p350_p0 = por %p349_p13, %p348_p12 }
  0x1e   :  { %p351_p1 = pnand %p350_p0, %p344_p11 }
  0x20   :  { %354 = shalt.err (!%p351_p1)
}
  0x21   :  { %s385_s0 = smov 64   ;;  %s386_s7 = smov 4  }
  0x22   :  { %32 = dma.hbm_to_vmem [thread:$0]  %s455_s1, 2048, %s408_s15, [#allocation7], %s385_s0, %s385_s0, %s386_s7  }
  0x23   :  { %377 = dma.done.wait [#allocation4], 256  }
  0x24   :  { %378 = vsyncadd [#allocation4], 4294967040 }
  0x25   :  { %379 = dma.done.wait [#allocation7], 2048  }
  0x26   :  { %380 = vsyncadd [#allocation7], 4294965248  ;;  %v295_v0 = vld [vmem:[#allocation6 + $0x40] sm:$0xff]   ;;  %v297_v2 = vld [vmem:[#allocation6 + $0x48] sm:$0xff]   ;;  %s387_s11 = smov [#allocation8]  }
  0x27   :  { %v296_v1 = vld [vmem:[#allocation6] sm:$0xff]   ;;  %268 = vmatprep.subr.bf16.mxu0 %v295_v0  ;;  %v298_v3 = vld [vmem:[#allocation6 + $0x8] sm:$0xff]   ;;  %v299_v4 = vld [vmem:[#allocation6 + $0x50] sm:$0xff]   ;;  %s241_s12 = sshll.u32 %s387_s11, 4  ;;  %s242_s12 = int_to_ptr.vmem [resolvable:$true] %s241_s12 }
  0x28   :  { %269 = vmatpush3.bf16.msra.mxu0 %v296_v1  ;;  %v300_v5 = vld [vmem:[#allocation6 + $0x10] sm:$0xff]   ;;  %v301_v6 = vld [vmem:[#allocation6 + $0x58] sm:$0xff]   ;;  %v303_v8 = vld [vmem:[#allocation6 + $0x60] sm:$0xff]   ;;  %s355_s13 = scalar_lea.vmem %s242_s12, 128  ;;  %p360_p3 = scmp.lt.s32.totalorder %s242_s12, %s242_s12 }
  0x29   :  { %270 = vmatprep.subr.bf16.mxu0 %v297_v2  ;;  %v302_v7 = vld [vmem:[#allocation6 + $0x18] sm:$0xff]   ;;  %v304_v9 = vld [vmem:[#allocation6 + $0x20] sm:$0xff]   ;;  %v305_v10 = vld [vmem:[#allocation6 + $0x68] sm:$0xff]   ;;  %p356_p2 = scmp.ne.s32.totalorder %s242_s12, %s355_s13  ;;  %p361_p4 = scmp.lt.s32.totalorder %s355_s13, %s355_s13 }
  0x2a   :  { %v49_v11 = vld [vmem:[#allocation3 + $0x8] sm:$0xff]  ;;  %v306_v13 = vld [vmem:[#allocation6 + $0x28] sm:$0xff]   ;;  %v307_v14 = vld [vmem:[#allocation6 + $0x70] sm:$0xff]  }
  0x2b   :  { %v51_v12 = vpack.c.bf16 %v49_v11, %v49_v11  ;;  %v308_v15 = vld [vmem:[#allocation6 + $0x30] sm:$0xff]   ;;  %v309_v16 = vld [vmem:[#allocation6 + $0x78] sm:$0xff]   ;;  %p362_p5 = por %p361_p4, %p360_p3 }
  0x2c   :  { %271 = vmatpush3.bf16.msra.mxu0 %v298_v3  ;;  %v310_v17 = vld [vmem:[#allocation6 + $0x38] sm:$0xff]   ;;  %v48_v18 = vld [vmem:[#allocation3] sm:$0xff] }
  0x2d   :  { %272 = vmatprep.subr.bf16.mxu0 %v299_v4  ;;  %212 = vmatprep.mubr.bf16.mxu0 %v51_v12  ;;  %v50_v19 = vpack.c.bf16 %v48_v18, %v48_v18  ;;  %v267_v22 = vld [vmem:[%s456_s2] ss:$0 sm:$0xff]  ;;  %p363_p6 = pnand %p362_p5, %p356_p2 }
  0x30   :  { %273 = vmatpush3.bf16.msra.mxu0 %v300_v5 }
  0x31   :  { %274 = vmatprep.subr.bf16.mxu0 %v301_v6 }
  0x34   :  { %275 = vmatpush3.bf16.msra.mxu0 %v302_v7 }
  0x35   :  { %276 = vmatprep.subr.bf16.mxu0 %v303_v8 }
  0x38   :  { %277 = vmatpush3.bf16.msra.mxu0 %v304_v9 }
  0x39   :  { %278 = vmatprep.subr.bf16.mxu0 %v305_v10 }
  0x3c   :  { %279 = vmatpush3.bf16.msra.mxu0 %v306_v13 }
  0x3d   :  { %280 = vmatprep.subr.bf16.mxu0 %v307_v14 }
  0x40   :  { %281 = vmatpush3.bf16.msra.mxu0 %v308_v15 }
  0x41   :  { %282 = vmatprep.subr.bf16.mxu0 %v309_v16 }
  0x44   :  { %283 = vmatpush3.bf16.msra.mxu0 %v310_v17 }
  0x47   :  { %213 = vmatmul.mubr.bf16.vlgmr.msra.gmra.mrb[0].mxu0 %v50_v19 }
 0x11a   :  { %v284_v20 = vpop.f32.mrb[0].mxu0 }
 0x11b   :  { %v285_v21 = vpop.f32.mrb[1].mxu0 }
 0x11c   :  { %v286_v23 = vadd.f32 %v285_v21, %v284_v20  ;;  %v287_v24 = vpop.f32.mrb[2].mxu0 }
 0x11d   :  { %v288_v25 = vpop.f32.mrb[3].mxu0 }
 0x11e   :  { %v233_v26 = vadd.f32 %v286_v23, %v267_v22 }
 0x120   :  { %234 = vst [vmem:[#allocation8] sm:$0xff] %v233_v26 }
 0x121   :  { %366 = shalt.err (!%p363_p6)
}
 0x122   :  { %s367_s16 = scalar_lea.hbm %s457_s3, 128 }
 0x123   :  { %p368_p7 = scmp.ne.s32.totalorder %s457_s3, %s367_s16  ;;  %p371_p8 = scmp.lt.u32.totalorder %s367_s16, %s457_s3 }
 0x125   :  { %p373_p9 = pnand %p371_p8, %p368_p7 }
 0x127   :  { %376 = shalt.err (!%p373_p9)
}
 0x128   :  { %244 = dma.vmem_to_hbm [thread:$0]  %s242_s12, 128, %s457_s3, [#allocation5]  }
 0x129   :  { %381 = dma.done.wait [#allocation5], 128  }
 0x12a   :  { %382 = vsyncadd [#allocation5], 4294967168 }
 0x12b   :  { %248 = vsyncpa [#allocation4], 1 }
 0x12c   :  { %249 = vsyncpa [#allocation7], 1 }
 0x12d   :  { %250 = vsyncpa [#allocation5], 1 }

</bundles_post_ra>
